<compile_context>
chip_gen: v6e
topology: v6e:2x2x1
jax: 0.10.0
libtpu: 0.0.40
codegen_flags: <defaults>
</compile_context>

<pallas_src>
import functools

import jax
import jax.numpy as jnp
from jax.experimental import pallas as pl
from jax.experimental.pallas import tpu as pltpu


# ------------------------------ Pallas kernels ------------------------------ #

def _fast_recip(d):
    """EUP approximate reciprocal + one Newton-Raphson refinement (VPU).

    Keeps the single EUP slot free for the one exp() per element while staying
    well within f32 tolerance (seed error ~2^-12 -> ~2^-24 after one NR step).
    """
    r = pl.reciprocal(d, approx=True)
    return r * (2.0 - d * r)


def _row_channel_ids(r0, n_rows, P, A):
    """Per-row channel index p = row % P and anchor index a = (row // P) % A.

    Computed with float math (exact for these small integers) so no integer
    vector div/mod lowering is needed.  Returns (n_rows, 1) f32 arrays.
    """
    rows = (r0 + jax.lax.broadcasted_iota(jnp.int32, (n_rows, 1), 0)).astype(jnp.float32)
    q = jnp.floor((rows + 0.5) * (1.0 / P))        # rows // P
    p = rows - q * P                               # rows %  P
    a = q - A * jnp.floor((q + 0.5) * (1.0 / A))   # (rows // P) % A
    return p, a


def _decode_eval_kernel(x_ref, o_ref, *, P, A, stride, anchors_px, nx):
    """Inference decode of one (row-tile, spatial-tile) block.

    x_ref/o_ref: (RT, TS) slabs of the flattened (B*A*P, ny*nx) prediction.
    Rows encode (batch, anchor, channel); lanes encode spatial s = gy*nx + gx.
        p in {0,1}: (sigmoid(x) + grid_offset) * stride
        p in {2,3}: exp(x) * anchor_px      (= exp(x) * anchor_wh * stride)
        p >= 4    : sigmoid(x)
    All constants are compile-time closure values; no side input streams.
    """
    x = x_ref[...].astype(jnp.float32)                        # (RT, TS)
    RT, TS = x.shape
    r0 = pl.program_id(0) * RT
    c0 = pl.program_id(1) * TS

    p, a = _row_channel_ids(r0, RT, P, A)                     # (RT, 1)

    # Per-row multiplier: stride for xy rows, pixel anchor w/h for wh, else 1.
    aw = jnp.full_like(a, anchors_px[0][0])
    ah = jnp.full_like(a, anchors_px[0][1])
    for i in range(1, A):
        aw = jnp.where(a == float(i), anchors_px[i][0], aw)
        ah = jnp.where(a == float(i), anchors_px[i][1], ah)
    mul = jnp.where(p < 1.5, stride, 1.0)
    mul = jnp.where(p == 2.0, aw, mul)
    mul = jnp.where(p == 3.0, ah, mul)                        # (RT, 1)

    # Per-lane grid offsets, applied only to the xy rows (p == 0 / p == 1).
    cols = (c0 + jax.lax.broadcasted_iota(jnp.int32, (1, TS), 1)).astype(jnp.float32)
    gy = jnp.floor((cols + 0.5) * (1.0 / nx))                 # col // nx
    gx = cols - gy * nx                                       # col %  nx
    add = jnp.where(p == 0.0, gx, jnp.where(p == 1.0, gy, 0.0))   # (RT, TS)

    # One exp per element; sigmoid(x) = 1/(1+e), exp(x) = 1/e with e = exp(-x).
    e = jnp.exp(-x)
    sig = _fast_recip(1.0 + e)
    ex = _fast_recip(e)
    is_wh = (p == 2.0) | (p == 3.0)                           # (RT, 1)
    act = jnp.where(is_wh, ex, sig)

    o_ref[...] = ((act + add) * mul).astype(o_ref.dtype)


def _decode_train_kernel(x_ref, o_ref, *, P, A):
    """Training decode: sigmoid on xy/conf/cls rows, raw wh rows."""
    x = x_ref[...].astype(jnp.float32)
    RT = x.shape[0]
    r0 = pl.program_id(0) * RT
    p, _ = _row_channel_ids(r0, RT, P, A)
    is_wh = (p == 2.0) | (p == 3.0)
    sig = _fast_recip(1.0 + jnp.exp(-x))
    o_ref[...] = jnp.where(is_wh, x, sig).astype(o_ref.dtype)


# ------------------------------ tiling / wrappers ---------------------------- #

def _choose_tiles(n_rows, n_cols, elem_bytes, target_bytes=2 << 20):
    """Pick (row_tile, lane_tile) for the 2-D elementwise decode.

    Row tile: a multiple of 8 dividing n_rows (else the full extent).
    Lane tile: a multiple of 128 dividing n_cols (else the full extent).
    Blocks grow toward ~2 MB to amortize the ~0.35 us per-grid-step overhead;
    in+out double-buffered at that size stays far below every chip's scoped
    VMEM limit (including v7x's 32 MiB default).
    """
    lane_opts = [d for d in range(128, n_cols + 1, 128) if n_cols % d == 0] or [n_cols]
    row_opts = [d for d in range(8, n_rows + 1, 8) if n_rows % d == 0] or [n_rows]
    li, ri = len(lane_opts) - 1, len(row_opts) - 1
    # Shrink rows first (keep lanes as wide as possible), then lanes.
    while row_opts[ri] * lane_opts[li] * elem_bytes > target_bytes and (ri > 0 or li > 0):
        if ri > 0:
            ri -= 1
        else:
            li -= 1
    return row_opts[ri], lane_opts[li]


def build_yolov3_layer_consts(img_size, grids, mask, anchors, n_classes):
    """Compile-time constants equivalent to the module's registered buffers."""
    if isinstance(img_size, (list, tuple)):
        img_size = max(img_size)
    ny, nx = int(grids[0]), int(grids[1])
    stride = float(img_size) / float(max(grids))
    A = len(mask)
    P = n_classes + 5
    # out_wh = exp(x) * anchor_wh * stride = exp(x) * anchor_px, so only the
    # pixel anchors of the masked set are needed.
    anchors_px = tuple((float(anchors[i][0]), float(anchors[i][1])) for i in mask)
    return dict(ny=ny, nx=nx, A=A, P=P, stride=stride, anchors_px=anchors_px)


def yolov3_layer_forward(prediction, consts, training=False, channels_last=True):
    """Forward of YoloV3Layer.  prediction: (B, A*P, ny, nx) NCHW.

    channels_last=True reproduces the module's output layout exactly (the
    permutation is a pure layout pass done by XLA on the kernel output);
    consumers that accept channel-major data can pass False and skip that
    extra HBM pass.
    """
    B, C, H, W = prediction.shape
    A, P = consts["A"], consts["P"]
    assert C == A * P, (C, A, P)
    S = H * W
    R = B * A * P

    x = prediction.reshape(R, S)                     # contiguous relabel, free
    elem_bytes = jnp.dtype(prediction.dtype).itemsize
    RT, TS = _choose_tiles(R, S, elem_bytes)
    grid = (R // RT, S // TS)
    # TODO(synk): when S is not a multiple of 128 (real YOLO 13/26/52 grids)
    # the spatial axis falls back to one full-extent block; padding S to a
    # multiple of 256 would give >=2 parallel spatial steps for v7x megacore.

    if training:
        kernel = functools.partial(_decode_train_kernel, P=P, A=A)
    else:
        # Eval uses the registered-buffer grid like the torch module does.
        assert (H, W) == (consts["ny"], consts["nx"]), "grid size mismatch with buffers"
        kernel = functools.partial(
            _decode_eval_kernel, P=P, A=A, stride=consts["stride"],
            anchors_px=consts["anchors_px"], nx=consts["nx"])

    out = pl.pallas_call(
        kernel,
        grid=grid,
        in_specs=[pl.BlockSpec((RT, TS), lambda r, s: (r, s))],
        out_specs=pl.BlockSpec((RT, TS), lambda r, s: (r, s)),
        out_shape=jax.ShapeDtypeStruct((R, S), prediction.dtype),
        compiler_params=pltpu.CompilerParams(
            dimension_semantics=("parallel", "parallel")),
    )(x)

    if training:
        y = out.reshape(B, A, P, H, W)
        return y.transpose(0, 1, 3, 4, 2) if channels_last else y
    y = out.reshape(B, A, P, S)
    if not channels_last:
        return y                                     # lane-dense (B, A, P, ny*nx)
    return y.transpose(0, 1, 3, 2).reshape(B, A * S, P)


# ------------------------------ pure-JAX reference --------------------------- #

def reference_forward_eval(pred, img_size, grids, mask, anchors, n_classes):
    B, C, H, W = pred.shape
    A = len(mask)
    P = n_classes + 5
    stride = float(img_size) / float(max(grids))
    anc = jnp.asarray([anchors[i] for i in mask], jnp.float32)          # (A, 2)
    anchor_wh = (anc / stride).reshape(1, A, 1, 1, 2)
    yv, xv = jnp.meshgrid(jnp.arange(H, dtype=jnp.float32),
                          jnp.arange(W, dtype=jnp.float32), indexing="ij")
    grid_xy = jnp.stack((xv, yv), 2).reshape(1, 1, H, W, 2)
    p = pred.reshape(B, A, P, H, W).transpose(0, 1, 3, 4, 2)
    xy = jax.nn.sigmoid(p[..., 0:2]) + grid_xy
    wh = jnp.exp(p[..., 2:4]) * anchor_wh
    conf = jax.nn.sigmoid(p[..., 4:5])
    cls = jax.nn.sigmoid(p[..., 5:])
    bboxes = jnp.concatenate((xy, wh), -1)
    out = jnp.concatenate((bboxes * stride, conf, cls), -1)
    return out.reshape(B, -1, P)


def reference_forward_train(pred, mask, n_classes):
    B, C, H, W = pred.shape
    A = len(mask)
    P = n_classes + 5
    p = pred.reshape(B, A, P, H, W).transpose(0, 1, 3, 4, 2)
    xy = jax.nn.sigmoid(p[..., 0:2])
    wh = p[..., 2:4]
    conf = jax.nn.sigmoid(p[..., 4:5])
    cls = jax.nn.sigmoid(p[..., 5:])
    return jnp.concatenate((xy, wh, conf, cls), -1)


# ------------------------------ test driver ---------------------------------- #

if __name__ == "__main__":
    key = jax.random.PRNGKey(0)

    img_size = 64
    grids = (16, 16)
    mask = [6, 7, 8]
    anchors = [(10, 13), (16, 30), (33, 23), (30, 61), (62, 45),
               (59, 119), (116, 90), (156, 198), (373, 326)]
    n_classes = 1
    A, P = len(mask), n_classes + 5
    B, H, W = 2, grids[0], grids[1]

    x = jax.random.normal(key, (B, A * P, H, W), jnp.float32)

    consts = build_yolov3_layer_consts(img_size, grids, mask, anchors, n_classes)

    # inference path (registered-buffer decode)
    fwd_eval = jax.jit(lambda p: yolov3_layer_forward(p, consts, training=False))
    out = jax.block_until_ready(fwd_eval(x))
    ref = jax.block_until_ready(
        reference_forward_eval(x, img_size, grids, mask, anchors, n_classes))
    assert out.shape == (B, A * H * W, P), out.shape
    assert jnp.allclose(out, ref, atol=1e-3, rtol=1e-3), float(
        jnp.max(jnp.abs(out - ref)))

    # training path (sigmoid xy/conf/cls, raw wh, 5-D output)
    fwd_train = jax.jit(lambda p: yolov3_layer_forward(p, consts, training=True))
    out_t = jax.block_until_ready(fwd_train(x))
    ref_t = jax.block_until_ready(reference_forward_train(x, mask, n_classes))
    assert out_t.shape == (B, A, H, W, P), out_t.shape
    assert jnp.allclose(out_t, ref_t, atol=1e-3, rtol=1e-3), float(
        jnp.max(jnp.abs(out_t - ref_t)))

    print("KERNEL_OK")
</pallas_src>

<mosaic_0001>
module attributes {stable_mosaic.version = 11 : i64} {
  func.func @_decode_eval_kernel(%arg0: i32, %arg1: i32, %arg2: memref<36x256xf32, #tpu.memory_space<vmem>>, %arg3: memref<36x256xf32, #tpu.memory_space<vmem>>) attributes {dimension_semantics = [#tpu.dimension_semantics<parallel>, #tpu.dimension_semantics<parallel>], iteration_bounds = array<i64: 1, 1>, scalar_prefetch = 0 : i64, scratch_operands = 0 : i64, tpu.core_type = #tpu.core_type<tc>, window_params = [{transform_indices = @transform_0, window_bounds = array<i64: 36, 256>}, {transform_indices = @transform_1, window_bounds = array<i64: 36, 256>}]} {
    %c0 = arith.constant 0 : index
    %c0_0 = arith.constant 0 : index
    %0 = vector.load %arg2[%c0, %c0_0] : memref<36x256xf32, #tpu.memory_space<vmem>>, vector<36x256xf32>
    %c36_i32 = arith.constant 36 : i32
    %1 = arith.muli %arg0, %c36_i32 : i32
    %c256_i32 = arith.constant 256 : i32
    %2 = arith.muli %arg1, %c256_i32 : i32
    %3 = tpu.iota {dimensions = array<i32: 0>} : vector<36x1xi32>
    %4 = vector.broadcast %1 : i32 to vector<36x1xi32>
    %5 = arith.addi %4, %3 : vector<36x1xi32>
    %6 = arith.sitofp %5 : vector<36x1xi32> to vector<36x1xf32>
    %cst = arith.constant 5.000000e-01 : f32
    %7 = vector.broadcast %cst : f32 to vector<36x1xf32>
    %8 = arith.addf %6, %7 : vector<36x1xf32>
    %cst_1 = arith.constant 0.166666672 : f32
    %9 = vector.broadcast %cst_1 : f32 to vector<36x1xf32>
    %10 = arith.mulf %8, %9 : vector<36x1xf32>
    %11 = math.floor %10 : vector<36x1xf32>
    %cst_2 = arith.constant 6.000000e+00 : f32
    %12 = vector.broadcast %cst_2 : f32 to vector<36x1xf32>
    %13 = arith.mulf %11, %12 : vector<36x1xf32>
    %14 = arith.subf %6, %13 : vector<36x1xf32>
    %cst_3 = arith.constant 5.000000e-01 : f32
    %15 = vector.broadcast %cst_3 : f32 to vector<36x1xf32>
    %16 = arith.addf %11, %15 : vector<36x1xf32>
    %cst_4 = arith.constant 0.333333343 : f32
    %17 = vector.broadcast %cst_4 : f32 to vector<36x1xf32>
    %18 = arith.mulf %16, %17 : vector<36x1xf32>
    %19 = math.floor %18 : vector<36x1xf32>
    %cst_5 = arith.constant 3.000000e+00 : f32
    %20 = vector.broadcast %cst_5 : f32 to vector<36x1xf32>
    %21 = arith.mulf %20, %19 : vector<36x1xf32>
    %22 = arith.subf %11, %21 : vector<36x1xf32>
    %cst_6 = arith.constant 1.160000e+02 : f32
    %23 = vector.broadcast %cst_6 : f32 to vector<36x1xf32>
    %cst_7 = arith.constant 9.000000e+01 : f32
    %24 = vector.broadcast %cst_7 : f32 to vector<36x1xf32>
    %cst_8 = arith.constant 1.000000e+00 : f32
    %25 = vector.broadcast %cst_8 : f32 to vector<36x1xf32>
    %26 = arith.cmpf oeq, %22, %25 : vector<36x1xf32>
    %cst_9 = arith.constant 1.560000e+02 : f32
    %27 = vector.broadcast %cst_9 : f32 to vector<36x1xf32>
    %28 = arith.select %26, %27, %23 : vector<36x1xi1>, vector<36x1xf32>
    %cst_10 = arith.constant 1.000000e+00 : f32
    %29 = vector.broadcast %cst_10 : f32 to vector<36x1xf32>
    %30 = arith.cmpf oeq, %22, %29 : vector<36x1xf32>
    %cst_11 = arith.constant 1.980000e+02 : f32
    %31 = vector.broadcast %cst_11 : f32 to vector<36x1xf32>
    %32 = arith.select %30, %31, %24 : vector<36x1xi1>, vector<36x1xf32>
    %cst_12 = arith.constant 2.000000e+00 : f32
    %33 = vector.broadcast %cst_12 : f32 to vector<36x1xf32>
    %34 = arith.cmpf oeq, %22, %33 : vector<36x1xf32>
    %cst_13 = arith.constant 3.730000e+02 : f32
    %35 = vector.broadcast %cst_13 : f32 to vector<36x1xf32>
    %36 = arith.select %34, %35, %28 : vector<36x1xi1>, vector<36x1xf32>
    %cst_14 = arith.constant 2.000000e+00 : f32
    %37 = vector.broadcast %cst_14 : f32 to vector<36x1xf32>
    %38 = arith.cmpf oeq, %22, %37 : vector<36x1xf32>
    %cst_15 = arith.constant 3.260000e+02 : f32
    %39 = vector.broadcast %cst_15 : f32 to vector<36x1xf32>
    %40 = arith.select %38, %39, %32 : vector<36x1xi1>, vector<36x1xf32>
    %cst_16 = arith.constant 1.500000e+00 : f32
    %41 = vector.broadcast %cst_16 : f32 to vector<36x1xf32>
    %42 = arith.cmpf olt, %14, %41 : vector<36x1xf32>
    %cst_17 = arith.constant 4.000000e+00 : f32
    %cst_18 = arith.constant 1.000000e+00 : f32
    %43 = vector.broadcast %cst_17 : f32 to vector<36x1xf32>
    %44 = vector.broadcast %cst_18 : f32 to vector<36x1xf32>
    %45 = arith.select %42, %43, %44 : vector<36x1xi1>, vector<36x1xf32>
    %cst_19 = arith.constant 2.000000e+00 : f32
    %46 = vector.broadcast %cst_19 : f32 to vector<36x1xf32>
    %47 = arith.cmpf oeq, %14, %46 : vector<36x1xf32>
    %48 = arith.select %47, %36, %45 : vector<36x1xi1>, vector<36x1xf32>
    %cst_20 = arith.constant 3.000000e+00 : f32
    %49 = vector.broadcast %cst_20 : f32 to vector<36x1xf32>
    %50 = arith.cmpf oeq, %14, %49 : vector<36x1xf32>
    %51 = arith.select %50, %40, %48 : vector<36x1xi1>, vector<36x1xf32>
    %52 = tpu.iota {dimensions = array<i32: 1>} : vector<1x256xi32>
    %53 = vector.broadcast %2 : i32 to vector<1x256xi32>
    %54 = arith.addi %53, %52 : vector<1x256xi32>
    %55 = arith.sitofp %54 : vector<1x256xi32> to vector<1x256xf32>
    %cst_21 = arith.constant 5.000000e-01 : f32
    %56 = vector.broadcast %cst_21 : f32 to vector<1x256xf32>
    %57 = arith.addf %55, %56 : vector<1x256xf32>
    %cst_22 = arith.constant 6.250000e-02 : f32
    %58 = vector.broadcast %cst_22 : f32 to vector<1x256xf32>
    %59 = arith.mulf %57, %58 : vector<1x256xf32>
    %60 = math.floor %59 : vector<1x256xf32>
    %cst_23 = arith.constant 1.600000e+01 : f32
    %61 = vector.broadcast %cst_23 : f32 to vector<1x256xf32>
    %62 = arith.mulf %60, %61 : vector<1x256xf32>
    %63 = arith.subf %55, %62 : vector<1x256xf32>
    %cst_24 = arith.constant 0.000000e+00 : f32
    %64 = vector.broadcast %cst_24 : f32 to vector<36x1xf32>
    %65 = arith.cmpf oeq, %14, %64 : vector<36x1xf32>
    %cst_25 = arith.constant 1.000000e+00 : f32
    %66 = vector.broadcast %cst_25 : f32 to vector<36x1xf32>
    %67 = arith.cmpf oeq, %14, %66 : vector<36x1xf32>
    %cst_26 = arith.constant 0.000000e+00 : f32
    %68 = vector.shape_cast %67 : vector<36x1xi1> to vector<36x1xi1>
    %69 = vector.broadcast %68 : vector<36x1xi1> to vector<36x256xi1>
    %70 = vector.shape_cast %60 : vector<1x256xf32> to vector<1x256xf32>
    %71 = vector.broadcast %70 : vector<1x256xf32> to vector<36x256xf32>
    %72 = vector.broadcast %cst_26 : f32 to vector<36x256xf32>
    %73 = arith.select %69, %71, %72 : vector<36x256xi1>, vector<36x256xf32>
    %74 = vector.shape_cast %65 : vector<36x1xi1> to vector<36x1xi1>
    %75 = vector.broadcast %74 : vector<36x1xi1> to vector<36x256xi1>
    %76 = vector.shape_cast %63 : vector<1x256xf32> to vector<1x256xf32>
    %77 = vector.broadcast %76 : vector<1x256xf32> to vector<36x256xf32>
    %78 = arith.select %75, %77, %73 : vector<36x256xi1>, vector<36x256xf32>
    %cst_27 = arith.constant 0.000000e+00 : f32
    %79 = vector.broadcast %cst_27 : f32 to vector<36x256xf32>
    %80 = arith.subf %79, %0 : vector<36x256xf32>
    %81 = math.exp %80 : vector<36x256xf32>
    %cst_28 = arith.constant 1.000000e+00 : f32
    %82 = vector.broadcast %cst_28 : f32 to vector<36x256xf32>
    %83 = arith.addf %82, %81 : vector<36x256xf32>
    %84 = tpu.reciprocal %83 {approx = true} : vector<36x256xf32> -> vector<36x256xf32>
    %85 = arith.mulf %83, %84 : vector<36x256xf32>
    %cst_29 = arith.constant 2.000000e+00 : f32
    %86 = vector.broadcast %cst_29 : f32 to vector<36x256xf32>
    %87 = arith.subf %86, %85 : vector<36x256xf32>
    %88 = arith.mulf %84, %87 : vector<36x256xf32>
    %89 = tpu.reciprocal %81 {approx = true} : vector<36x256xf32> -> vector<36x256xf32>
    %90 = arith.mulf %81, %89 : vector<36x256xf32>
    %cst_30 = arith.constant 2.000000e+00 : f32
    %91 = vector.broadcast %cst_30 : f32 to vector<36x256xf32>
    %92 = arith.subf %91, %90 : vector<36x256xf32>
    %93 = arith.mulf %89, %92 : vector<36x256xf32>
    %cst_31 = arith.constant 2.000000e+00 : f32
    %94 = vector.broadcast %cst_31 : f32 to vector<36x1xf32>
    %95 = arith.cmpf oeq, %14, %94 : vector<36x1xf32>
    %cst_32 = arith.constant 3.000000e+00 : f32
    %96 = vector.broadcast %cst_32 : f32 to vector<36x1xf32>
    %97 = arith.cmpf oeq, %14, %96 : vector<36x1xf32>
    %98 = arith.ori %95, %97 : vector<36x1xi1>
    %99 = vector.shape_cast %98 : vector<36x1xi1> to vector<36x1xi1>
    %100 = vector.broadcast %99 : vector<36x1xi1> to vector<36x256xi1>
    %101 = arith.select %100, %93, %88 : vector<36x256xi1>, vector<36x256xf32>
    %102 = arith.addf %101, %78 : vector<36x256xf32>
    %103 = vector.broadcast %51 : vector<36x1xf32> to vector<36x256xf32>
    %104 = arith.mulf %102, %103 : vector<36x256xf32>
    %c0_33 = arith.constant 0 : index
    %c0_34 = arith.constant 0 : index
    %105 = vector.load %arg3[%c0_33, %c0_34] : memref<36x256xf32, #tpu.memory_space<vmem>>, vector<36x256xf32>
    tpu.vector_store %arg3[%c0_33, %c0_34], %104 {strides = array<i32>} : memref<36x256xf32, #tpu.memory_space<vmem>>, vector<36x256xf32>,
    return
  }
  func.func @transform_0(%arg0: i32, %arg1: i32) -> (i32, i32) {
    %c0_i32 = arith.constant 0 : i32
    return %arg0, %arg1 : i32, i32
  }
  func.func @transform_1(%arg0: i32, %arg1: i32) -> (i32, i32) {
    %c0_i32 = arith.constant 0 : i32
    return %arg0, %arg1 : i32, i32
  }
}

</mosaic_0001>

<bundles_post_ra>
// kernel: _lambda_.1
= control target key start
LH: loop header
LB: loop body
LE: loop exit
PB: predicated region body
PF: predicated region fallthrough
CT: control target
= control target key end

     0   :  { %v20_v0 = vlaneseq  ;;  %s846_s0 = inlined_call_operand.vmem [shape: f32[36,256], index: 0, kind: input, shape index: {}]   ;;  %s847_s1 = inlined_call_operand.vmem [shape: f32[36,256], index: 1, kind: output, shape index: {}]  }
   0x1   :  { %v8_v1 = vld [vmem:[%s846_s0] sm:$0xff]  ;;  %v9_v2 = vld [vmem:[%s846_s0 + $0x8] sm:$0xff]  ;;  %v10_v3 = vld [vmem:[%s846_s0 + $0x10] sm:$0xff] }
   0x2   :  { %v479_v4 = vshrl.u32 %v20_v0, 7  ;;  %v481_v5 = vand.u32 127, %v20_v0  ;;  %v215_v6 = vsub.f32 0.0, %v8_v1  ;;  %v216_v7 = vsub.f32 0.0, %v9_v2  ;;  %v11_v8 = vld [vmem:[%s846_s0 + $0x18] sm:$0xff]  ;;  %v12_v15 = vld [vmem:[%s846_s0 + $0x20] sm:$0xff] }
   0x3   :  { %v217_v9 = vsub.f32 0.0, %v10_v3  ;;  %v218_v10 = vsub.f32 0.0, %v11_v8  ;;  %v219_v28 = vsub.f32 0.0, %v12_v15  ;;  %v13_v38 = vld [vmem:[%s846_s0 + $0x28] sm:$0xff]  ;;  %v458_v15 = vmov 116.0  }
   0x4   :  { %v32_v11 = vcvt.s32.f32 %v479_v4  ;;  %v153_v12 = vcvt.s32.f32 %v481_v5  ;;  %v225_v13 = vmul.f32 1.442695, %v215_v6  ;;  %v489_v14 = vadd.s32 128, %v481_v5 }
   0x5   :  { %v227_v16 = vmul.f32 1.442695, %v216_v7  ;;  %v22_v17 = vadd.s32 8, %v479_v4  ;;  %v229_v18 = vmul.f32 1.442695, %v217_v9  ;;  %v496_v19 = vadd.s32 16, %v479_v4 }
   0x6   :  { %v37_v20 = vadd.f32 0.5, %v32_v11  ;;  %v155_v21 = vadd.f32 0.5, %v153_v12  ;;  %397 = vpow2.f32 %v225_v13  ;;  %v154_v22 = vcvt.s32.f32 %v489_v14 }
   0x7   :  { %399 = vpow2.f32 %v227_v16  ;;  %v33_v23 = vcvt.s32.f32 %v22_v17  ;;  %v34_v24 = vcvt.s32.f32 %v496_v19  ;;  %v231_v27 = vmul.f32 1.442695, %v218_v10 }
   0x8   :  { %v42_v25 = vmul.f32 0.16666667, %v37_v20  ;;  %v156_v26 = vadd.f32 0.5, %v154_v22  ;;  %401 = vpow2.f32 %v229_v18  ;;  %v157_v31 = vmul.f32 0.0625, %v155_v21 }
   0x9   :  { %v38_v29 = vadd.f32 0.5, %v33_v23  ;;  %v39_v34 = vadd.f32 0.5, %v34_v24  ;;  %403 = vpow2.f32 %v231_v27  ;;  %v233_v37 = vmul.f32 1.442695, %v219_v28 }
   0xa   :  { %v47_v30 = vfloor.f32 %v42_v25  ;;  %v158_v32 = vmul.f32 0.0625, %v156_v26  ;;  %v505_v41 = vfloor.f32 %v157_v31  ;;  %v220_v45 = vsub.f32 0.0, %v13_v38 }
   0xb   :  { %v43_v33 = vmul.f32 0.16666667, %v38_v29  ;;  %v44_v44 = vmul.f32 0.16666667, %v39_v34  ;;  %405 = vpow2.f32 %v233_v37  ;;  %v512_v48 = vadd.s32 24, %v479_v4 }
   0xc   :  { %v52_v35 = vmul.f32 6.0, %v47_v30  ;;  %v62_v36 = vadd.f32 0.5, %v47_v30  ;;  %v507_v42 = vfloor.f32 %v158_v32  ;;  %v161_v50 = vmul.f32 16.0, %v505_v41 }
   0xd   :  { %v48_v39 = vfloor.f32 %v43_v33  ;;  %v518_v55 = vfloor.f32 %v44_v44  ;;  %v520_v56 = vmul.f32 1.442695, %v220_v45  ;;  %v35_v62 = vcvt.s32.f32 %v512_v48 }
   0xe   :  { %v67_v40 = vmul.f32 0.33333334, %v62_v36  ;;  %v509_v46 = vsub.f32 %v32_v11, %v52_v35  ;;  %v162_v53 = vmul.f32 16.0, %v507_v42  ;;  %v537_v0 = vsub.f32 %v153_v12, %v161_v50 }
   0xf   :  { %v63_v43 = vadd.f32 0.5, %v48_v39  ;;  %v53_v51 = vmul.f32 6.0, %v48_v39  ;;  %v54_v6 = vmul.f32 6.0, %v518_v55  ;;  %v64_v7 = vadd.f32 0.5, %v518_v55 }
  0x10   :  { %v72_v47 = vfloor.f32 %v67_v40  ;;  %vm170_vm0 = vcmp.eq.f32.partialorder %v509_v46, 1.0  ;;  %vm117_vm1 = vcmp.lt.f32.partialorder %v509_v46, 1.5  ;;  %vm165_vm2 = vcmp.eq.f32.partialorder %v509_v46, 0.0 }
  0x11   :  { %v68_v54 = vmul.f32 0.33333334, %v63_v43  ;;  %v540_v1 = vsub.f32 %v33_v23, %v53_v51  ;;  %v185_v2 = vsel %vm170_vm0, %v505_v41, 0.0  ;;  %v547_v5 = vsub.f32 %v154_v22, %v162_v53 }
  0x12   :  { %v77_v49 = vmul.f32 3.0, %v72_v47  ;;  %vm127_vm4 = vcmp.eq.f32.partialorder %v509_v46, 2.0  ;;  %v186_v9 = vsel %vm170_vm0, %v507_v42, 0.0  ;;  %v457_v12 = vmov 1.0  }
  0x13   :  { %v515_v52 = vpop.eup %397  ;;  %v73_v61 = vfloor.f32 %v68_v54  ;;  %v122_v13 = vsel %vm117_vm1, 4.0, %v457_v12  ;;  %v566_v14 = vsel %vm165_vm2, %v537_v0, %v185_v2  ;;  %vm118_vm5 = vcmp.lt.f32.partialorder %v540_v1, 1.5 }
  0x14   :  { %v522_v57 = vpop.eup %399  ;;  %v82_v58 = vsub.f32 %v47_v30, %v77_v49  ;;  %v526_v59 = vadd.f32 1.0, %v515_v52  ;;  %407 = vrcp.f32 %v515_v52  ;;  %vm137_vm7 = vcmp.eq.f32.partialorder %v509_v46, 3.0 }
  0x15   :  { %v530_v60 = vadd.f32 1.0, %v522_v57  ;;  %409 = vrcp.f32 %v522_v57  ;;  %v534_v63 = vpop.eup %401  ;;  %v78_v3 = vmul.f32 3.0, %v73_v61  ;;  %v459_v17 = vmov 90.0   ;;  %vm649_vm0 = vmor %vm127_vm4, %vm137_vm7 }
  0x16   :  { %411 = vrcp.f32 %v526_v59  ;;  %vm87_vm3 = vcmp.eq.f32.partialorder %v82_v58, 1.0  ;;  %v551_v8 = vpop.eup %403  ;;  %v558_v11 = vadd.f32 1.0, %v534_v63  ;;  %vm102_vm6 = vcmp.eq.f32.partialorder %v82_v58, 2.0 }
  0x17   :  { %413 = vrcp.f32 %v530_v60  ;;  %v83_v10 = vsub.f32 %v48_v39, %v78_v3  ;;  %v92_v16 = vsel %vm87_vm3, 156.0, %v458_v15  ;;  %v97_v18 = vsel %vm87_vm3, 198.0, %v459_v17 }
  0x18   :  { %415 = vrcp.f32 %v534_v63  ;;  %v579_v20 = vsel %vm165_vm2, %v547_v5, %v186_v9  ;;  %v582_v21 = vadd.f32 1.0, %v551_v8  ;;  %v586_v22 = vsub.f32 %v34_v24, %v54_v6  ;;  %v588_v23 = vpop.eup %405 }
  0x19   :  { %vm88_vm8 = vcmp.eq.f32.partialorder %v83_v10, 1.0  ;;  %417 = vrcp.f32 %v558_v11  ;;  %vm103_vm9 = vcmp.eq.f32.partialorder %v83_v10, 2.0  ;;  %v69_v26 = vmul.f32 0.33333334, %v64_v7  ;;  %v15_v7 = vld [vmem:[%s846_s0 + $0x38] sm:$0xff] }
  0x1a   :  { %v93_v25 = vsel %vm88_vm8, 156.0, %v458_v15  ;;  %419 = vrcp.f32 %v551_v8  ;;  %v107_v27 = vsel %vm102_vm6, 373.0, %v92_v16  ;;  %v123_v28 = vsel %vm118_vm5, 4.0, %v457_v12 }
  0x1b   :  { %vm128_vm10 = vcmp.eq.f32.partialorder %v540_v1, 2.0  ;;  %421 = vrcp.f32 %v582_v21  ;;  %v112_v19 = vsel %vm102_vm6, 326.0, %v97_v18  ;;  %vm138_vm11 = vcmp.eq.f32.partialorder %v540_v1, 3.0 }
  0x1c   :  { %vm171_vm12 = vcmp.eq.f32.partialorder %v540_v1, 1.0  ;;  %v74_v24 = vfloor.f32 %v69_v26  ;;  %v98_v29 = vsel %vm88_vm8, 198.0, %v459_v17  ;;  %v108_v30 = vsel %vm103_vm9, 373.0, %v93_v25  ;;  %vm685_vm6 = vmor %vm128_vm10, %vm138_vm11 }
  0x1d   :  { %v606_v31 = vadd.f32 1.0, %v588_v23  ;;  %423 = vrcp.f32 %v588_v23  ;;  %v132_v33 = vsel %vm127_vm4, %v107_v27, %v122_v13  ;;  %vm166_vm13 = vcmp.eq.f32.partialorder %v540_v1, 0.0 }
  0x1e   :  { %v79_v34 = vmul.f32 3.0, %v74_v24  ;;  %425 = vpow2.f32 %v520_v56  ;;  %v187_v37 = vsel %vm171_vm12, %v505_v41, 0.0  ;;  %v188_v38 = vsel %vm171_vm12, %v507_v42, 0.0  ;;  %v14_v56 = vld [vmem:[%s846_s0 + $0x30] sm:$0xff] }
  0x1f   :  { %427 = vrcp.f32 %v606_v31  ;;  %v113_v43 = vsel %vm103_vm9, 326.0, %v98_v29  ;;  %v133_v44 = vsel %vm128_vm10, %v108_v30, %v123_v28  ;;  %v142_v49 = vsel %vm137_vm7, %v112_v19, %v132_v33 }
  0x20   :  { %v622_v45 = vsub.f32 %v518_v55, %v79_v34  ;;  %vm119_vm14 = vcmp.lt.f32.partialorder %v586_v22, 1.5  ;;  %v207_v54 = vsel %vm166_vm13, %v537_v0, %v187_v37  ;;  %v635_v55 = vsel %vm166_vm13, %v547_v5, %v188_v38 }
  0x21   :  { %v408_v32 = vpop.eup %407  ;;  %v654_v6 = vsel %vm119_vm14, 4.0, %v457_v12  ;;  %vm172_vm1 = vcmp.eq.f32.partialorder %v586_v22, 1.0  ;;  %vm129_vm2 = vcmp.eq.f32.partialorder %v586_v22, 2.0  ;;  %vm139_vm3 = vcmp.eq.f32.partialorder %v586_v22, 3.0 }
  0x22   :  { %v410_v35 = vpop.eup %409  ;;  %v305_v36 = vmul.f32 %v408_v32, %v515_v52  ;;  %vm89_vm15 = vcmp.eq.f32.partialorder %v622_v45, 1.0  ;;  %v40_v46 = vadd.f32 0.5, %v35_v62  ;;  %v221_v16 = vsub.f32 0.0, %v14_v56  ;;  %vm718_vm7 = vmor %vm129_vm2, %vm139_vm3 }
  0x23   :  { %v412_v39 = vpop.eup %411  ;;  %v306_v40 = vmul.f32 %v410_v35, %v522_v57  ;;  %v94_v26 = vsel %vm89_vm15, 156.0, %v458_v15  ;;  %vm104_vm4 = vcmp.eq.f32.partialorder %v622_v45, 2.0  ;;  %vm167_vm5 = vcmp.eq.f32.partialorder %v586_v22, 0.0 }
  0x24   :  { %v414_v47 = vpop.eup %413  ;;  %v265_v50 = vmul.f32 %v412_v39, %v526_v59  ;;  %v315_v51 = vsub.f32 2.0, %v305_v36  ;;  %v642_v59 = vsel %vm138_vm11, %v113_v43, %v133_v44  ;;  %v99_v19 = vsel %vm89_vm15, 198.0, %v459_v17 }
  0x25   :  { %v266_v52 = vmul.f32 %v414_v47, %v530_v60  ;;  %v316_v53 = vsub.f32 2.0, %v306_v40  ;;  %v416_v60 = vpop.eup %415  ;;  %v222_v24 = vsub.f32 0.0, %v15_v7  ;;  %v45_v43 = vmul.f32 0.16666667, %v40_v46 }
  0x26   :  { %v275_v57 = vsub.f32 2.0, %v265_v50  ;;  %v325_v58 = vmul.f32 %v408_v32, %v315_v51  ;;  %v418_v9 = vpop.eup %417  ;;  %v307_v13 = vmul.f32 %v416_v60, %v534_v63  ;;  %v237_v1 = vmul.f32 1.442695, %v221_v16 }
  0x27   :  { %v276_v2 = vsub.f32 2.0, %v266_v52  ;;  %v326_v3 = vmul.f32 %v410_v35, %v316_v53  ;;  %v267_v25 = vmul.f32 %v418_v9, %v558_v11  ;;  %v420_v63 = vpop.eup %419  ;;  %v239_v61 = vmul.f32 1.442695, %v222_v24 }
  0x28   :  { %v285_v10 = vmul.f32 %v412_v39, %v275_v57  ;;  %v317_v28 = vsub.f32 2.0, %v307_v13  ;;  %v422_v29 = vpop.eup %421  ;;  %v308_v33 = vmul.f32 %v420_v63, %v551_v8  ;;  %v723_v46 = vadd.s32 32, %v479_v4  ;;  %v17_v4 = vld [vmem:[%s846_s0 + $0x48] sm:$0xf] }
  0x29   :  { %v286_v18 = vmul.f32 %v414_v47, %v276_v2  ;;  %v277_v32 = vsub.f32 2.0, %v267_v25  ;;  %v268_v37 = vmul.f32 %v422_v29, %v582_v21 }
  0x2a   :  { %v350_v27 = vsel %vm649_vm0, %v325_v58, %v285_v10  ;;  %v327_v35 = vmul.f32 %v416_v60, %v317_v28  ;;  %v424_v38 = vpop.eup %423  ;;  %v318_v8 = vsub.f32 2.0, %v308_v33  ;;  %v189_v58 = vsel %vm172_vm1, %v505_v41, 0.0 }
  0x2b   :  { %v360_v11 = vadd.f32 %v350_v27, %v566_v14  ;;  %v351_v30 = vsel %vm649_vm0, %v326_v3, %v286_v18  ;;  %v109_v14 = vsel %vm104_vm4, 373.0, %v94_v26  ;;  %v287_v40 = vmul.f32 %v418_v9, %v277_v32 }
  0x2c   :  { %v361_v34 = vadd.f32 %v351_v30, %v579_v20  ;;  %v426_v20 = vpop.eup %425  ;;  %v278_v47 = vsub.f32 2.0, %v268_v37  ;;  %v309_v50 = vmul.f32 %v424_v38, %v588_v23  ;;  %v328_v52 = vmul.f32 %v420_v63, %v318_v8 }
  0x2d   :  { %v370_v39 = vmul.f32 %v360_v11, %v142_v49  ;;  %v428_v51 = vpop.eup %427  ;;  %v352_v21 = vsel %vm685_vm6, %v327_v35, %v287_v40  ;;  %v250_v53 = vadd.f32 1.0, %v426_v20  ;;  %429 = vrcp.f32 %v426_v20 }
  0x2e   :  { %v371_v44 = vmul.f32 %v361_v34, %v142_v49  ;;  %v362_v49 = vadd.f32 %v352_v21, %v207_v54  ;;  %v288_v56 = vmul.f32 %v422_v29, %v278_v47  ;;  %v269_v23 = vmul.f32 %v428_v51, %v606_v31 }
  0x2f   :  { %380 = vst [vmem:[%s847_s1] sm:$0xff] %v370_v39  ;;  %v319_v57 = vsub.f32 2.0, %v309_v50  ;;  %431 = vrcp.f32 %v250_v53  ;;  %v50_v60 = vfloor.f32 %v45_v43  ;;  %v114_v31 = vsel %vm104_vm4, 326.0, %v99_v19 }
  0x30   :  { %381 = vst [vmem:[%s847_s1 + $0x8] sm:$0xff] %v371_v44  ;;  %v372_v2 = vmul.f32 %v362_v49, %v642_v59  ;;  %v353_v3 = vsel %vm685_vm6, %v328_v52, %v288_v56  ;;  %v279_v7 = vsub.f32 2.0, %v269_v23  ;;  %v134_v10 = vsel %vm129_vm2, %v109_v14, %v654_v6  ;;  %v16_v6 = vld [vmem:[%s846_s0 + $0x40] sm:$0xf] }
  0x31   :  { %v329_v9 = vmul.f32 %v424_v38, %v319_v57  ;;  %v363_v54 = vadd.f32 %v353_v3, %v635_v55  ;;  %v209_v45 = vsel %vm167_vm5, %v537_v0, %v189_v58  ;;  %433 = vpow2.f32 %v237_v1 }
  0x32   :  { %382 = vst [vmem:[%s847_s1 + $0x10] sm:$0xff] %v372_v2  ;;  %v289_v55 = vmul.f32 %v428_v51, %v279_v7  ;;  %v65_v18 = vadd.f32 0.5, %v50_v60  ;;  %v144_v25 = vsel %vm139_vm3, %v114_v31, %v134_v10  ;;  %435 = vpow2.f32 %v239_v61 }
  0x33   :  { %v373_v16 = vmul.f32 %v363_v54, %v642_v59  ;;  %v36_v27 = vcvt.s32.f32 %v723_v46  ;;  %v223_v59 = vsub.f32 0.0, %v16_v6  ;;  %v224_v28 = vsub.f32 0.0, %v17_v4 }
  0x34   :  { %v354_v26 = vsel %vm718_vm7, %v329_v9, %v289_v55  ;;  %v70_v24 = vmul.f32 0.33333334, %v65_v18  ;;  %v190_v39 = vsel %vm172_vm1, %v507_v42, 0.0  ;;  %v55_v21 = vmul.f32 6.0, %v50_v60 }
  0x35   :  { %383 = vst [vmem:[%s847_s1 + $0x18] sm:$0xff] %v373_v16  ;;  %v364_v63 = vadd.f32 %v354_v26, %v209_v45  ;;  %v41_v29 = vadd.f32 0.5, %v36_v27  ;;  %v241_v11 = vmul.f32 1.442695, %v223_v59  ;;  %v243_v30 = vmul.f32 1.442695, %v224_v28 }
  0x36   :  { %v75_v35 = vfloor.f32 %v70_v24  ;;  %v60_v57 = vsub.f32 %v35_v62, %v55_v21 }
  0x37   :  { %v374_v19 = vmul.f32 %v364_v63, %v144_v25  ;;  %v46_v32 = vmul.f32 0.16666667, %v41_v29  ;;  %437 = vpow2.f32 %v241_v11 }
  0x38   :  { %439 = vpow2.f32 %v243_v30  ;;  %v80_v47 = vmul.f32 3.0, %v75_v35  ;;  %vm120_vm9 = vcmp.lt.f32.partialorder %v60_v57, 1.5  ;;  %vm173_vm11 = vcmp.eq.f32.partialorder %v60_v57, 1.0 }
  0x39   :  { %384 = vst [vmem:[%s847_s1 + $0x20] sm:$0xff] %v374_v19  ;;  %v51_v36 = vfloor.f32 %v46_v32  ;;  %v125_v10 = vsel %vm120_vm9, 4.0, %v457_v12  ;;  %vm168_vm12 = vcmp.eq.f32.partialorder %v60_v57, 0.0  ;;  %v191_v46 = vsel %vm173_vm11, %v505_v41, 0.0 }
  0x3a   :  { %v430_v33 = vpop.eup %429  ;;  %v85_v56 = vsub.f32 %v50_v60, %v80_v47  ;;  %vm130_vm13 = vcmp.eq.f32.partialorder %v60_v57, 2.0  ;;  %vm140_vm14 = vcmp.eq.f32.partialorder %v60_v57, 3.0  ;;  %v192_v16 = vsel %vm173_vm11, %v507_v42, 0.0 }
  0x3b   :  { %v310_v34 = vmul.f32 %v430_v33, %v426_v20  ;;  %v66_v40 = vadd.f32 0.5, %v51_v36  ;;  %v210_v20 = vsel %vm167_vm5, %v547_v5, %v190_v39  ;;  %v56_v60 = vmul.f32 6.0, %v51_v36  ;;  %vm790_vm1 = vmor %vm130_vm13, %vm140_vm14 }
  0x3c   :  { %v432_v37 = vpop.eup %431  ;;  %vm90_vm8 = vcmp.eq.f32.partialorder %v85_v56, 1.0  ;;  %vm105_vm10 = vcmp.eq.f32.partialorder %v85_v56, 2.0  ;;  %v212_v32 = vsel %vm168_vm12, %v547_v5, %v192_v16 }
  0x3d   :  { %v270_v14 = vmul.f32 %v432_v37, %v250_v53  ;;  %v320_v38 = vsub.f32 2.0, %v310_v34  ;;  %v71_v53 = vmul.f32 0.33333334, %v66_v40  ;;  %v95_v48 = vsel %vm90_vm8, 156.0, %v458_v15 }
  0x3e   :  { %v434_v8 = vpop.eup %433  ;;  %v100_v54 = vsel %vm90_vm8, 198.0, %v459_v17  ;;  %v110_v31 = vsel %vm105_vm10, 373.0, %v95_v48  ;;  %v778_v13 = vsub.f32 %v36_v27, %v56_v60  ;;  %v211_v27 = vsel %vm168_vm12, %v537_v0, %v191_v46 }
  0x3f   :  { %v280_v43 = vsub.f32 2.0, %v270_v14  ;;  %v330_v44 = vmul.f32 %v430_v33, %v320_v38  ;;  %v251_v50 = vadd.f32 1.0, %v434_v8  ;;  %441 = vrcp.f32 %v434_v8  ;;  %v436_v1 = vpop.eup %435 }
  0x40   :  { %v252_v52 = vadd.f32 1.0, %v436_v1  ;;  %v76_v61 = vfloor.f32 %v71_v53  ;;  %v115_v4 = vsel %vm105_vm10, 326.0, %v100_v54  ;;  %vm121_vm15 = vcmp.lt.f32.partialorder %v778_v13, 1.5 }
  0x41   :  { %v290_v51 = vmul.f32 %v432_v37, %v280_v43  ;;  %443 = vrcp.f32 %v251_v50  ;;  %vm131_vm2 = vcmp.eq.f32.partialorder %v778_v13, 2.0  ;;  %vm174_vm3 = vcmp.eq.f32.partialorder %v778_v13, 1.0 }
  0x42   :  { %445 = vrcp.f32 %v436_v1  ;;  %v81_v62 = vmul.f32 3.0, %v76_v61  ;;  %vm141_vm5 = vcmp.eq.f32.partialorder %v778_v13, 3.0  ;;  %vm169_vm6 = vcmp.eq.f32.partialorder %v778_v13, 0.0 }
  0x43   :  { %v355_v49 = vsel %vm718_vm7, %v330_v44, %v290_v51  ;;  %447 = vrcp.f32 %v252_v52  ;;  %vm339_vm7 = vmor %vm131_vm2, %vm141_vm5 }
  0x44   :  { %v365_v23 = vadd.f32 %v355_v49, %v210_v20  ;;  %v438_v2 = vpop.eup %437  ;;  %v86_v55 = vsub.f32 %v51_v36, %v81_v62  ;;  %v126_v36 = vsel %vm121_vm15, 4.0, %v457_v12 }
  0x45   :  { %v759_v22 = vpop.eup %439  ;;  %v764_v3 = vadd.f32 1.0, %v438_v2  ;;  %449 = vrcp.f32 %v438_v2 }
  0x46   :  { %v375_v58 = vmul.f32 %v365_v23, %v144_v25  ;;  %v767_v7 = vadd.f32 1.0, %v759_v22  ;;  %451 = vrcp.f32 %v759_v22  ;;  %v135_v25 = vsel %vm130_vm13, %v110_v31, %v125_v10 }
  0x47   :  { %453 = vrcp.f32 %v764_v3  ;;  %vm91_vm0 = vcmp.eq.f32.partialorder %v86_v55, 1.0  ;;  %v145_v11 = vsel %vm140_vm14, %v115_v4, %v135_v25  ;;  %vm106_vm4 = vcmp.eq.f32.partialorder %v86_v55, 2.0 }
  0x48   :  { %385 = vst [vmem:[%s847_s1 + $0x28] sm:$0xff] %v375_v58  ;;  %455 = vrcp.f32 %v767_v7  ;;  %v96_v38 = vsel %vm91_vm0, 156.0, %v458_v15  ;;  %v101_v47 = vsel %vm91_vm0, 198.0, %v459_v17  ;;  %v193_v15 = vsel %vm174_vm3, %v505_v41, 0.0 }
  0x49   :  { %v111_v51 = vsel %vm106_vm4, 373.0, %v96_v38  ;;  %v116_v23 = vsel %vm106_vm4, 326.0, %v101_v47  ;;  %v194_v58 = vsel %vm174_vm3, %v507_v42, 0.0  ;;  %v213_v60 = vsel %vm169_vm6, %v537_v0, %v193_v15 }
  0x4c   :  { %v442_v9 = vpop.eup %441 }
  0x4d   :  { %v311_v45 = vmul.f32 %v442_v9, %v434_v8 }
  0x4e   :  { %v444_v6 = vpop.eup %443 }
  0x4f   :  { %v446_v18 = vpop.eup %445  ;;  %v271_v26 = vmul.f32 %v444_v6, %v251_v50  ;;  %v321_v63 = vsub.f32 2.0, %v311_v45 }
  0x50   :  { %v448_v59 = vpop.eup %447  ;;  %v312_v28 = vmul.f32 %v446_v18, %v436_v1 }
  0x51   :  { %v281_v19 = vsub.f32 2.0, %v271_v26  ;;  %v331_v24 = vmul.f32 %v442_v9, %v321_v63  ;;  %v272_v29 = vmul.f32 %v448_v59, %v252_v52 }
  0x52   :  { %v322_v33 = vsub.f32 2.0, %v312_v28  ;;  %v450_v37 = vpop.eup %449 }
  0x53   :  { %v291_v34 = vmul.f32 %v444_v6, %v281_v19  ;;  %v282_v35 = vsub.f32 2.0, %v272_v29  ;;  %v452_v39 = vpop.eup %451  ;;  %v313_v43 = vmul.f32 %v450_v37, %v438_v2  ;;  %v136_v2 = vsel %vm131_vm2, %v111_v51, %v126_v36 }
  0x54   :  { %v332_v14 = vmul.f32 %v446_v18, %v322_v33  ;;  %v454_v44 = vpop.eup %453  ;;  %v314_v50 = vmul.f32 %v452_v39, %v759_v22  ;;  %v146_v62 = vsel %vm141_vm5, %v116_v23, %v136_v2 }
  0x55   :  { %v356_v40 = vsel %vm790_vm1, %v331_v24, %v291_v34  ;;  %v292_v8 = vmul.f32 %v448_v59, %v282_v35  ;;  %v456_v1 = vpop.eup %455  ;;  %v273_v21 = vmul.f32 %v454_v44, %v764_v3  ;;  %v323_v52 = vsub.f32 2.0, %v313_v43 }
  0x56   :  { %v366_v12 = vadd.f32 %v356_v40, %v211_v27  ;;  %v274_v56 = vmul.f32 %v456_v1, %v767_v7  ;;  %v324_v17 = vsub.f32 2.0, %v314_v50  ;;  %v214_v7 = vsel %vm169_vm6, %v547_v5, %v194_v58 }
  0x57   :  { %v357_v20 = vsel %vm790_vm1, %v332_v14, %v292_v8  ;;  %v283_v57 = vsub.f32 2.0, %v273_v21  ;;  %v333_v41 = vmul.f32 %v450_v37, %v323_v52 }
  0x58   :  { %v376_v53 = vmul.f32 %v366_v12, %v145_v11  ;;  %v367_v49 = vadd.f32 %v357_v20, %v212_v32  ;;  %v284_v22 = vsub.f32 2.0, %v274_v56  ;;  %v334_v3 = vmul.f32 %v452_v39, %v324_v17 }
  0x59   :  { %v293_v42 = vmul.f32 %v454_v44, %v283_v57 }
  0x5a   :  { %386 = vst [vmem:[%s847_s1 + $0x30] sm:$0xff] %v376_v53  ;;  %v377_v61 = vmul.f32 %v367_v49, %v145_v11  ;;  %v294_v48 = vmul.f32 %v456_v1, %v284_v22 }
  0x5b   :  { %v358_v9 = vsel %vm339_vm7, %v333_v41, %v293_v42 }
  0x5c   :  { %387 = vst [vmem:[%s847_s1 + $0x38] sm:$0xff] %v377_v61  ;;  %v368_v54 = vadd.f32 %v358_v9, %v213_v60  ;;  %v359_v31 = vsel %vm339_vm7, %v334_v3, %v294_v48 }
  0x5d   :  { %v369_v10 = vadd.f32 %v359_v31, %v214_v7 }
  0x5e   :  { %v378_v46 = vmul.f32 %v368_v54, %v146_v62 }
  0x5f   :  { %v379_v45 = vmul.f32 %v369_v10, %v146_v62 }
  0x60   :  { %388 = vst [vmem:[%s847_s1 + $0x40] sm:$0xf] %v378_v46 }
  0x61   :  { %389 = vst [vmem:[%s847_s1 + $0x48] sm:$0xf] %v379_v45 }

</bundles_post_ra>
